<compile_context>
chip_gen: v5e
topology: v5e:2x2
jax: 0.10.0
libtpu: 0.0.40
codegen_flags: <defaults>
</compile_context>

<pallas_src>
import functools

import jax
import jax.numpy as jnp
from jax.experimental import pallas as pl


def gcn_vae_kernel(xT_ref, adjT_ref, w1T_ref, w23T_ref, muT_ref, logvarT_ref):
    # All operands arrive bf16, transposed, node axis (N) last (lane axis).
    xT = xT_ref[...]        # [F_in, N]
    adjT = adjT_ref[...]    # [N, N]     (adj transposed; adj symmetric => == adj)
    w1T = w1T_ref[...]      # [H1, F_in]
    w23T = w23T_ref[...]    # [2*H2, H1] (W2 ++ W3, transposed)

    # gc1: h1 = relu(adj @ (x @ W1))  computed as h1^T = relu((W1^T x^T) adj^T)
    s1T = jnp.dot(w1T, xT, preferred_element_type=jnp.float32)          # [H1, N] f32
    h1T = jnp.maximum(
        jnp.dot(s1T.astype(jnp.bfloat16), adjT,
                preferred_element_type=jnp.float32),
        0.0,
    )                                                                   # [H1, N] f32

    # gc2/gc3 fused: out23 = adj @ (h1 @ W23)
    # computed as out23^T = (W23^T h1^T) adj^T
    s23T = jnp.dot(w23T, h1T.astype(jnp.bfloat16),
                   preferred_element_type=jnp.float32)                  # [2*H2, N] f32
    out23T = jnp.dot(s23T.astype(jnp.bfloat16), adjT,
                     preferred_element_type=jnp.float32)                # [2*H2, N] f32

    h2 = muT_ref.shape[0]
    muT_ref[...] = out23T[:h2, :]       # lane-dense [H2, N] store (N = 128)
    logvarT_ref[...] = out23T[h2:, :]   # lane-dense [H2, N] store


def prepare_weights(w1, w2, w3):
    """One-time weight preprocessing: fuse W2||W3, transpose, cast to bf16."""
    w23 = jnp.concatenate([w2, w3], axis=1)            # [H1, 2*H2]
    w1T = w1.T.astype(jnp.bfloat16)                     # [H1, Fin]
    w23T = w23.T.astype(jnp.bfloat16)                   # [2*H2, H1]
    return w1T, w23T


def prepare_inputs(x, adj):
    """Per-graph input preprocessing (do once if x/adj are reused)."""
    xT = x.T.astype(jnp.bfloat16)                       # [Fin, N]
    adjT = adj.T.astype(jnp.bfloat16)                   # [N, N]
    return xT, adjT


def _encode_t(xT, adjT, w1T, w23T):
    Fin, N = xT.shape
    H1 = w1T.shape[0]
    H2 = w23T.shape[0] // 2
    assert adjT.shape == (N, N)
    assert w1T.shape == (H1, Fin)
    assert w23T.shape == (2 * H2, H1)

    # Advisory cost model so XLA can schedule this small custom call.
    flops = 2 * (H1 * Fin * N + H1 * N * N + 2 * H2 * H1 * N + 2 * H2 * N * N)
    bytes_in = 2 * (Fin * N + N * N + H1 * Fin + 2 * H2 * H1)   # bf16 operands
    bytes_out = 2 * H2 * N * 4                                  # two f32 outputs
    cost = pl.CostEstimate(flops=flops, transcendentals=0,
                           bytes_accessed=bytes_in + bytes_out)

    full = lambda shape: pl.BlockSpec(shape, lambda: (0, 0))

    muT, logvarT = pl.pallas_call(
        gcn_vae_kernel,
        out_shape=(
            jax.ShapeDtypeStruct((H2, N), jnp.float32),
            jax.ShapeDtypeStruct((H2, N), jnp.float32),
        ),
        in_specs=[
            full(xT.shape),
            full(adjT.shape),
            full(w1T.shape),
            full(w23T.shape),
        ],
        out_specs=(full((H2, N)), full((H2, N))),
        cost_estimate=cost,
    )(xT, adjT, w1T, w23T)
    return muT, logvarT


@functools.partial(jax.jit)
def gcn_model_vae_forward_t(xT, adjT, w1T, w23T):
    """Hot path: prepared (transposed, bf16) operands in, transposed outputs out.

    Returns (zT, muT, logvarT), each [H2, N] (lane-dense). Eval-mode
    reparameterize is identity, so zT aliases muT (same as PyTorch eval, where
    `return mu` hands back the same tensor object).
    """
    muT, logvarT = _encode_t(xT, adjT, w1T, w23T)
    return muT, muT, logvarT


def gcn_model_vae_forward(x, adj, w1, w2, w3):
    """Convenience wrapper matching the PyTorch layout ([N, H2] outputs).

    Does per-call preprocessing + one transpose per output; prefer
    prepare_weights/prepare_inputs + gcn_model_vae_forward_t in a loop.
    """
    w1T, w23T = prepare_weights(w1, w2, w3)
    xT, adjT = prepare_inputs(x, adj)
    zT, muT, logvarT = gcn_model_vae_forward_t(xT, adjT, w1T, w23T)
    mu = muT.T
    logvar = logvarT.T
    z = mu  # eval mode: reparameterize(mu, logvar) == mu (aliases, as in PyTorch)
    return z, mu, logvar


def _glorot(key, shape):
    # Mirrors the gae GraphConvolution glorot-style init, deterministically.
    fan_in, fan_out = shape
    limit = jnp.sqrt(6.0 / (fan_in + fan_out))
    return jax.random.uniform(key, shape, jnp.float32, -limit, limit)


if __name__ == "__main__":
    key = jax.random.PRNGKey(0)
    k_x, k_adj, k_w1, k_w2, k_w3 = jax.random.split(key, 5)

    # Small, GCN-consistent shapes: N nodes, feature dims.
    N, F_IN, H1, H2 = 128, 32, 32, 16

    x = jax.random.normal(k_x, (N, F_IN), jnp.float32)

    # Symmetric normalization D^-1/2 (A + I) D^-1/2, matching the gae
    # preprocessing. adj is symmetric, so adj.T == adj.
    a_raw = (jax.random.uniform(k_adj, (N, N)) < 0.1).astype(jnp.float32)
    a_sym = jnp.maximum(a_raw, a_raw.T) + jnp.eye(N, dtype=jnp.float32)
    d_isqrt = 1.0 / jnp.sqrt(jnp.sum(a_sym, axis=1))
    adj = a_sym * d_isqrt[:, None] * d_isqrt[None, :]

    w1 = _glorot(k_w1, (F_IN, H1))
    w2 = _glorot(k_w2, (H1, H2))
    w3 = _glorot(k_w3, (H1, H2))

    # One-time preprocessing, then the hot-path (prepared-operand) forward.
    w1T, w23T = prepare_weights(w1, w2, w3)
    xT, adjT = prepare_inputs(x, adj)
    zT, muT, logvarT = gcn_model_vae_forward_t(xT, adjT, w1T, w23T)
    jax.block_until_ready((zT, muT, logvarT))

    # PyTorch-layout view (one transpose per output, no slices).
    mu, logvar, z = muT.T, logvarT.T, zT.T

    # Reference 1: plain JAX with the SAME bf16-input / f32-accumulate recipe
    # as the kernel (only summation order may differ) -> tight tolerance.
    bf16, f32 = jnp.bfloat16, jnp.float32
    x_b, adj_b = x.astype(bf16), adj.astype(bf16)
    w1_b = w1.astype(bf16)
    w23_b = jnp.concatenate([w2, w3], axis=1).astype(bf16)

    s1 = jnp.dot(x_b, w1_b, preferred_element_type=f32).astype(bf16)
    h1 = jnp.maximum(jnp.dot(adj_b, s1, preferred_element_type=f32), 0.0)
    s23 = jnp.dot(h1.astype(bf16), w23_b, preferred_element_type=f32).astype(bf16)
    out23_ref = jnp.dot(adj_b, s23, preferred_element_type=f32)
    mu_ref = out23_ref[:, :H2]
    lv_ref = out23_ref[:, H2:]

    assert jnp.allclose(mu, mu_ref, atol=1e-3, rtol=1e-3)
    assert jnp.allclose(logvar, lv_ref, atol=1e-3, rtol=1e-3)
    assert jnp.allclose(z, mu_ref, atol=1e-3, rtol=1e-3)

    # Reference 2: pure-f32 forward (the true PyTorch semantics). Loose check
    # documenting the bf16-MXU quantization error (~1e-2 relative scale).
    h1_f = jnp.maximum(adj @ (x @ w1), 0.0)
    mu_f = adj @ (h1_f @ w2)
    lv_f = adj @ (h1_f @ w3)
    assert jnp.allclose(mu, mu_f, atol=5e-2, rtol=5e-2)
    assert jnp.allclose(logvar, lv_f, atol=5e-2, rtol=5e-2)

    print("KERNEL_OK")
</pallas_src>

<mosaic_0001>
module attributes {stable_mosaic.version = 11 : i64} {
  func.func @gcn_vae_kernel(%arg0: memref<32x128xbf16, #tpu.memory_space<vmem>>, %arg1: memref<128x128xbf16, #tpu.memory_space<vmem>>, %arg2: memref<32x32xbf16, #tpu.memory_space<vmem>>, %arg3: memref<32x32xbf16, #tpu.memory_space<vmem>>, %arg4: memref<16x128xf32, #tpu.memory_space<vmem>>, %arg5: memref<16x128xf32, #tpu.memory_space<vmem>>) attributes {dimension_semantics = [], scalar_prefetch = 0 : i64, scratch_operands = 0 : i64, tpu.core_type = #tpu.core_type<tc>} {
    %c0 = arith.constant 0 : index
    %c0_0 = arith.constant 0 : index
    %0 = vector.load %arg0[%c0, %c0_0] : memref<32x128xbf16, #tpu.memory_space<vmem>>, vector<32x128xbf16>
    %c0_1 = arith.constant 0 : index
    %c0_2 = arith.constant 0 : index
    %1 = vector.load %arg1[%c0_1, %c0_2] : memref<128x128xbf16, #tpu.memory_space<vmem>>, vector<128x128xbf16>
    %c0_3 = arith.constant 0 : index
    %c0_4 = arith.constant 0 : index
    %2 = vector.load %arg2[%c0_3, %c0_4] : memref<32x32xbf16, #tpu.memory_space<vmem>>, vector<32x32xbf16>
    %c0_5 = arith.constant 0 : index
    %c0_6 = arith.constant 0 : index
    %3 = vector.load %arg3[%c0_5, %c0_6] : memref<32x32xbf16, #tpu.memory_space<vmem>>, vector<32x32xbf16>
    %cst = arith.constant dense<0.000000e+00> : vector<32x128xf32>
    %4 = tpu.matmul %2, %0, %cst {dimension_numbers = #tpu.dot_dimension_numbers<[1], [0], [0], [1], [0, 0, 1, 1], [], []>} : vector<32x32xbf16>, vector<32x128xbf16>, vector<32x128xf32> -> vector<32x128xf32>
    %5 = arith.truncf %4 : vector<32x128xf32> to vector<32x128xbf16>
    %cst_7 = arith.constant dense<0.000000e+00> : vector<32x128xf32>
    %6 = tpu.matmul %5, %1, %cst_7 {dimension_numbers = #tpu.dot_dimension_numbers<[1], [0], [0], [1], [0, 0, 1, 1], [], []>} : vector<32x128xbf16>, vector<128x128xbf16>, vector<32x128xf32> -> vector<32x128xf32>
    %cst_8 = arith.constant 0.000000e+00 : f32
    %7 = vector.broadcast %cst_8 : f32 to vector<32x128xf32>
    %8 = arith.maximumf %6, %7 : vector<32x128xf32>
    %9 = arith.truncf %8 : vector<32x128xf32> to vector<32x128xbf16>
    %cst_9 = arith.constant dense<0.000000e+00> : vector<32x128xf32>
    %10 = tpu.matmul %3, %9, %cst_9 {dimension_numbers = #tpu.dot_dimension_numbers<[1], [0], [0], [1], [0, 0, 1, 1], [], []>} : vector<32x32xbf16>, vector<32x128xbf16>, vector<32x128xf32> -> vector<32x128xf32>
    %11 = arith.truncf %10 : vector<32x128xf32> to vector<32x128xbf16>
    %cst_10 = arith.constant dense<0.000000e+00> : vector<32x128xf32>
    %12 = tpu.matmul %11, %1, %cst_10 {dimension_numbers = #tpu.dot_dimension_numbers<[1], [0], [0], [1], [0, 0, 1, 1], [], []>} : vector<32x128xbf16>, vector<128x128xbf16>, vector<32x128xf32> -> vector<32x128xf32>
    %13 = vector.extract_strided_slice %12 {offsets = [0, 0], sizes = [16, 128], strides = [1, 1]} : vector<32x128xf32> to vector<16x128xf32>
    %c0_11 = arith.constant 0 : index
    %c0_12 = arith.constant 0 : index
    %14 = vector.load %arg4[%c0_11, %c0_12] : memref<16x128xf32, #tpu.memory_space<vmem>>, vector<16x128xf32>
    tpu.vector_store %arg4[%c0_11, %c0_12], %13 {strides = array<i32>} : memref<16x128xf32, #tpu.memory_space<vmem>>, vector<16x128xf32>,
    %15 = vector.extract_strided_slice %12 {offsets = [16, 0], sizes = [16, 128], strides = [1, 1]} : vector<32x128xf32> to vector<16x128xf32>
    %c0_13 = arith.constant 0 : index
    %c0_14 = arith.constant 0 : index
    %16 = vector.load %arg5[%c0_13, %c0_14] : memref<16x128xf32, #tpu.memory_space<vmem>>, vector<16x128xf32>
    tpu.vector_store %arg5[%c0_13, %c0_14], %15 {strides = array<i32>} : memref<16x128xf32, #tpu.memory_space<vmem>>, vector<16x128xf32>,
    return
  }
}

</mosaic_0001>

<bundles_post_ra>
// kernel: gcn_model_vae_forward_t.1
= control target key start
LH: loop header
LB: loop body
LE: loop exit
PB: predicated region body
PF: predicated region fallthrough
CT: control target
= control target key end

     0   :  { %11 = vsyncpa [#allocation3], 0  ;;  %s611_s0 = inlined_call_operand.hbm [shape: bf16[32,128], index: 0, kind: input, shape index: {}]   ;;  %s612_s1 = inlined_call_operand.hbm [shape: bf16[128,128], index: 1, kind: input, shape index: {}]   ;;  %s613_s2 = inlined_call_operand.hbm [shape: bf16[32,32], index: 2, kind: input, shape index: {}]   ;;  %s614_s3 = inlined_call_operand.hbm [shape: bf16[32,32], index: 3, kind: input, shape index: {}]   ;;  %s615_s4 = inlined_call_operand.vmem [shape: f32[16,128], index: 4, kind: output, shape index: {0}]   ;;  %s616_s5 = inlined_call_operand.hbm [shape: f32[16,128], index: 5, kind: output, shape index: {1}]  }
   0x1   :  { %12 = vsyncpa [#allocation6], 0 }
   0x2   :  { %13 = vsyncpa [#allocation9], 0 }
   0x3   :  { %14 = vsyncpa [#allocation4], 0  ;;  %s32_s20 = sshll.u32 %s612_s1, 4  ;;  %s547_s21 = smov [#allocation5]   ;;  %s33_s20 = int_to_ptr.hbm [resolvable:$true] %s32_s20 }
   0x4   :  { %s34_s22 = sshll.u32 %s547_s21, 4  ;;  %s19_s25 = sshll.u32 %s611_s0, 4  ;;  %s35_s22 = int_to_ptr.vmem [resolvable:$true] %s34_s22  ;;  %s20_s25 = int_to_ptr.hbm [resolvable:$true] %s19_s25 }
   0x5   :  { %s548_s26 = smov 64   ;;  %s549_s27 = smov 4  }
   0x6   :  { %40 = dma.hbm_to_vmem [thread:$0]  %s33_s20, 1024, %s35_s22, [#allocation6], %s548_s26, %s548_s26, %s549_s27  }
   0x7   :  { %s550_s28 = smov [#allocation2]   ;;  %s45_s7 = sshll.u32 %s613_s2, 4  ;;  %s46_s7 = int_to_ptr.hbm [resolvable:$true] %s45_s7 }
   0x8   :  { %s21_s29 = sshll.u32 %s550_s28, 4  ;;  %s58_s9 = sshll.u32 %s614_s3, 4  ;;  %s22_s29 = int_to_ptr.vmem [resolvable:$true] %s21_s29  ;;  %s59_s9 = int_to_ptr.hbm [resolvable:$true] %s58_s9 }
   0x9   :  { %27 = dma.hbm_to_vmem [thread:$0]  %s20_s25, 256, %s22_s29, [#allocation3], %s548_s26, %s548_s26, %s549_s27  }
   0xa   :  { %s551_s10 = smov [#allocation7]   ;;  %s552_s0 = smov [#allocation8]  }
   0xb   :  { %s47_s11 = sshll.u32 %s551_s10, 4  ;;  %s60_s12 = sshll.u32 %s552_s0, 4  ;;  %s48_s11 = int_to_ptr.vmem [resolvable:$true] %s47_s11  ;;  %s61_s12 = int_to_ptr.vmem [resolvable:$true] %s60_s12 }
   0xc   :  { %53 = dma.hbm_to_vmem [thread:$0]  %s46_s7, 256, %s48_s11, [#allocation6], %s548_s26, %s548_s26, %s549_s27  }
   0xd   :  { %66 = dma.hbm_to_vmem [thread:$0]  %s59_s9, 256, %s61_s12, [#allocation9], %s548_s26, %s548_s26, %s549_s27  }
   0xe   :  { %539 = dma.done.wait [#allocation3], 256  }
   0xf   :  { %540 = vsyncadd [#allocation3], 4294967040 }
  0x10   :  { %541 = dma.done.wait [#allocation6], 1280  }
  0x11   :  { %542 = vsyncadd [#allocation6], 4294966016 }
  0x12   :  { %543 = dma.done.wait [#allocation9], 256  }
  0x13   :  { %544 = vsyncadd [#allocation9], 4294967040  ;;  %v381_v0 = vld [vmem:[#allocation2 + $0x8] sm:$0xff]  ;;  %v380_v2 = vld [vmem:[#allocation2] sm:$0xff]  ;;  %vm134_vm0 = vcmask 261120   ;;  %s553_s15 = smov [#allocation10]  }
  0x14   :  { %v389_v1 = vld [vmem:[#allocation5 + $0x38] sm:$0xff]  ;;  %147 = vmatpush.bf16.msra.mxu0 %v381_v0  ;;  %v390_v3 = vld [vmem:[#allocation7] sm:$0xff]  ;;  %v388_v4 = vld [vmem:[#allocation5 + $0x30] sm:$0xff]  ;;  %s301_s16 = sshll.u32 %s553_s15, 4  ;;  %s303_s19 = sshll.u32 %s616_s5, 4  ;;  %s302_s16 = int_to_ptr.vmem [resolvable:$true] %s301_s16  ;;  %s304_s19 = int_to_ptr.hbm [resolvable:$true] %s303_s19 }
  0x15   :  { %394 = vmatpush.bf16.msra.mxu1 %v389_v1  ;;  %402 = vmatpush.bf16.msra.mxu3 %v389_v1  ;;  %v387_v5 = vld [vmem:[#allocation5 + $0x28] sm:$0xff]  ;;  %v386_v6 = vld [vmem:[#allocation5 + $0x20] sm:$0xff]  ;;  %v385_v7 = vld [vmem:[#allocation5 + $0x18] sm:$0xff]  ;;  %s554_s20 = smov 128   ;;  %s555_s21 = smov 8  }
  0x16   :  { %v391_v8 = vld [vmem:[#allocation7 + $0x8] sm:$0xff]  ;;  %v384_v9 = vld [vmem:[#allocation5 + $0x10] sm:$0xff]  ;;  %v382_v11 = vld [vmem:[#allocation5] sm:$0xff] }
  0x17   :  { %v383_v10 = vld [vmem:[#allocation5 + $0x8] sm:$0xff]  ;;  %v392_v28 = vld [vmem:[#allocation8] sm:$0xff]  ;;  %v393_v29 = vld [vmem:[#allocation8 + $0x8] sm:$0xff] }
  0x18   :  { %148 = vmatpush.bf16.msra.mxu0 %v380_v2 }
  0x19   :  { %395 = vmatpush.bf16.msra.mxu1 %v388_v4  ;;  %403 = vmatpush.bf16.msra.mxu3 %v388_v4 }
  0x1b   :  { %336 = vmatmul.msk.bf16.vlgmr.msra.gmra.mxu0 %vm134_vm0, %v390_v3 }
  0x1c   :  { %210 = vmatpush.bf16.msrb.mxu0 %v389_v1 }
  0x1d   :  { %396 = vmatpush.bf16.msra.mxu1 %v387_v5  ;;  %404 = vmatpush.bf16.msra.mxu3 %v387_v5 }
  0x20   :  { %211 = vmatpush.bf16.msrb.mxu0 %v388_v4 }
  0x21   :  { %397 = vmatpush.bf16.msra.mxu1 %v386_v6  ;;  %405 = vmatpush.bf16.msra.mxu3 %v386_v6 }
  0x24   :  { %212 = vmatpush.bf16.msrb.mxu0 %v387_v5 }
  0x25   :  { %398 = vmatpush.bf16.msra.mxu1 %v385_v7  ;;  %406 = vmatpush.bf16.msra.mxu3 %v385_v7 }
  0x28   :  { %213 = vmatpush.bf16.msrb.mxu0 %v386_v6 }
  0x29   :  { %399 = vmatpush.bf16.msra.mxu1 %v384_v9  ;;  %407 = vmatpush.bf16.msra.mxu3 %v384_v9 }
  0x2b   :  { %337 = vmatmul.msk.bf16.gmra.mxu0 %vm134_vm0, %v391_v8 }
  0x2c   :  { %214 = vmatpush.bf16.msrb.mxu0 %v385_v7 }
  0x2d   :  { %400 = vmatpush.bf16.msra.mxu1 %v383_v10  ;;  %408 = vmatpush.bf16.msra.mxu3 %v383_v10 }
  0x30   :  { %215 = vmatpush.bf16.msrb.mxu0 %v384_v9 }
  0x31   :  { %401 = vmatpush.bf16.msra.mxu1 %v382_v11  ;;  %409 = vmatpush.bf16.msra.mxu3 %v382_v11 }
  0x34   :  { %216 = vmatpush.bf16.msrb.mxu0 %v383_v10 }
  0x38   :  { %217 = vmatpush.bf16.msrb.mxu0 %v382_v11 }
  0x98   :  { %v150_v12 = vpop.f32.mrf.mxu0 }
  0xa0   :  { %v152_v13 = vpop.f32.mrf.mxu0 }
  0xa1   :  { %v160_v14 = vpack.c.bf16 %v152_v13, %v150_v12 }
  0xa3   :  { %218 = vmatmul.bf16.vlgmr.msrb.gmra.mxu0 %v160_v14 }
  0xa8   :  { %v155_v15 = vpop.f32.mrf.mxu0 }
  0xb0   :  { %v157_v16 = vpop.f32.mrf.mxu0 }
  0xb1   :  { %v161_v17 = vpack.c.bf16 %v157_v16, %v155_v15 }
  0xb3   :  { %223 = vmatmul.bf16.vlgmr.msra.gmra.mxu1 %v161_v17 }
 0x120   :  { %v219_v18 = vpop.f32.mrf.mxu0 }
 0x121   :  { %v229_v26 = vmax.f32 %v219_v18, 0.0 }
 0x128   :  { %v221_v20 = vpop.f32.mrf.mxu0 }
 0x129   :  { %v230_v24 = vmax.f32 %v221_v20, 0.0 }
 0x12b   :  { %v233_v27 = vpack.c.bf16 %v230_v24, %v229_v26 }
 0x130   :  { %v224_v19 = vpop.f32.mrf.mxu1 }
 0x131   :  { %v231_v22 = vmax.f32 %v224_v19, 0.0 }
 0x138   :  { %v226_v21 = vpop.f32.mrf.mxu1 }
 0x139   :  { %v232_v23 = vmax.f32 %v226_v21, 0.0 }
 0x13b   :  { %v234_v25 = vpack.c.bf16 %v232_v23, %v231_v22 }
 0x13d   :  { %257 = vmatpush.bf16.msra.mxu2 %v234_v25 }
 0x141   :  { %258 = vmatpush.bf16.msra.mxu2 %v233_v27 }
 0x144   :  { %378 = vmatmul.msk.bf16.vlgmr.msra.gmra.mxu2 %vm134_vm0, %v392_v28 }
 0x145   :  { %272 = vmatpush.bf16.msrb.mxu2 %v389_v1 }
 0x149   :  { %273 = vmatpush.bf16.msrb.mxu2 %v388_v4 }
 0x14d   :  { %274 = vmatpush.bf16.msrb.mxu2 %v387_v5 }
 0x151   :  { %275 = vmatpush.bf16.msrb.mxu2 %v386_v6 }
 0x154   :  { %379 = vmatmul.msk.bf16.gmra.mxu2 %vm134_vm0, %v393_v29 }
 0x155   :  { %276 = vmatpush.bf16.msrb.mxu2 %v385_v7 }
 0x159   :  { %277 = vmatpush.bf16.msrb.mxu2 %v384_v9 }
 0x15d   :  { %278 = vmatpush.bf16.msrb.mxu2 %v383_v10 }
 0x161   :  { %279 = vmatpush.bf16.msrb.mxu2 %v382_v11 }
 0x1c7   :  { %v260_v30 = vpop.f32.mrf.mxu2 }
 0x1cf   :  { %v262_v31 = vpop.f32.mrf.mxu2 }
 0x1d0   :  { %v270_v32 = vpack.c.bf16 %v262_v31, %v260_v30 }
 0x1d2   :  { %280 = vmatmul.bf16.vlgmr.msrb.gmra.mxu2 %v270_v32 }
 0x1d7   :  { %v265_v33 = vpop.f32.mrf.mxu2 }
 0x1df   :  { %v267_v34 = vpop.f32.mrf.mxu2 }
 0x1e0   :  { %v271_v35 = vpack.c.bf16 %v267_v34, %v265_v33 }
 0x1e2   :  { %285 = vmatmul.bf16.vlgmr.msra.gmra.mxu3 %v271_v35 }
 0x255   :  { %v281_v36 = vpop.f32.mrf.mxu2 }
 0x256   :  { %291 = vst [vmem:[%s615_s4] sm:$0xff] %v281_v36 }
 0x25d   :  { %v283_v37 = vpop.f32.mrf.mxu2 }
 0x25e   :  { %292 = vst [vmem:[%s615_s4 + $0x8] sm:$0xff] %v283_v37 }
 0x265   :  { %v286_v38 = vpop.f32.mrf.mxu3 }
 0x266   :  { %293 = vst [vmem:[#allocation10] sm:$0xff] %v286_v38 }
 0x26d   :  { %v288_v39 = vpop.f32.mrf.mxu3 }
 0x26e   :  { %294 = vst [vmem:[#allocation10 + $0x8] sm:$0xff] %v288_v39 }
 0x26f   :  { %309 = dma.vmem_to_hbm [thread:$0]  %s302_s16, 256, %s304_s19, [#allocation4], %s554_s20, %s554_s20, %s555_s21  }
 0x270   :  { %545 = dma.done.wait [#allocation4], 256  }
 0x271   :  { %546 = vsyncadd [#allocation4], 4294967040 }
 0x272   :  { %316 = vsyncpa [#allocation3], 1 }
 0x273   :  { %317 = vsyncpa [#allocation6], 1 }
 0x274   :  { %318 = vsyncpa [#allocation9], 1 }
 0x275   :  { %319 = vsyncpa [#allocation4], 1 }

</bundles_post_ra>
